<compile_context>
chip_gen: v5e
topology: v5e:2x2
jax: 0.10.0
libtpu: 0.0.40
codegen_flags: <defaults>
</compile_context>

<pallas_src>
import functools

import jax
import jax.numpy as jnp
from jax import lax
from jax.experimental import pallas as pl
from jax.experimental.pallas import tpu as pltpu

LN_EPS = 1e-5  # PyTorch nn.LayerNorm default


def _round_up(a, b):
    return (a + b - 1) // b * b


def _ln_kernel(h, gamma, beta, inv_n):
    """LayerNorm, E[x^2]-mu^2 form with folded affine.

    Divides by the *real* hidden size (inv_n), so zero-padded lanes
    (gamma=beta=0, h=0) contribute nothing and come out exactly 0.
    """
    mu = jnp.sum(h, axis=-1, keepdims=True) * inv_n
    msq = jnp.sum(h * h, axis=-1, keepdims=True) * inv_n
    scale = gamma * lax.rsqrt(msq - mu * mu + LN_EPS)
    return h * scale + (beta - mu * scale)


def classifier_kernel(x_ref, w1_ref, wa_ref, vec_ref, out_ref, *, inv_h):
    f32 = jnp.float32
    vec = vec_ref[...]                        # (11, Hp) packed f32 params
    b1, g1, be1 = vec[0:1], vec[1:2], vec[2:3]
    ga, bea = vec[3:4], vec[4:5]
    bwa = vec[5:6]
    gb, beb = vec[6:7], vec[7:8]
    wo_row = vec[8:9]                         # w_out^T                (skip path)
    wo_fold = vec[9:10]                       # (res_wb @ w_out)^T     (folded)
    c = vec[10:11, 0:1]                       # res_bb @ w_out + b_out (scalar)

    # Linear(D_in, H) -> LayerNorm -> ReLU        (Dropout = identity in eval)
    h = jnp.dot(x_ref[...], w1_ref[...], preferred_element_type=f32) + b1
    h = jnp.maximum(_ln_kernel(h, g1, be1, inv_h), 0.0)

    # Skip-path contribution of the final Linear(H,1), taken early so the big
    # (tb, Hp) activation `h` dies right after LN_a below.
    s = jnp.sum(h * wo_row, axis=-1, keepdims=True)

    # ResidualBlock branch: LN -> ReLU -> Linear -> LN -> ReLU -> [Dropout].
    # Its second Linear and the final Linear(H,1) are algebraically folded into
    # wo_fold / c (valid in eval mode: nothing nonlinear sits in between).
    r = jnp.maximum(_ln_kernel(h, ga, bea, inv_h), 0.0)
    r = jnp.dot(r.astype(wa_ref.dtype), wa_ref[...],
                preferred_element_type=f32) + bwa
    r = jnp.maximum(_ln_kernel(r, gb, beb, inv_h), 0.0)

    out_ref[...] = s + jnp.sum(r * wo_fold, axis=-1, keepdims=True) + c


def classifier_forward(x, params, *, tb=None, use_bf16=True):
    f32 = jnp.float32
    B, D_in = x.shape
    H = params["w1"].shape[1]
    Hp = _round_up(H, 128)                    # lane-dense hidden dimension

    # ---- generation-aware VMEM budget --------------------------------------
    try:
        info = pltpu.get_tpu_info()
        vmem_cap = int(getattr(info, "vmem_capacity_bytes", 64 * 1024 * 1024))
    except Exception:                         # pragma: no cover - defensive
        vmem_cap = 64 * 1024 * 1024           # conservative: v7x per-TC VMEM
    x_isz = 2 if use_bf16 else 4
    w_isz = 2 if use_bf16 else 4

    # ---- batch tile: VMEM- and MXU-aware -----------------------------------
    align = 16 if use_bf16 else 8             # bf16 sublane packing
    B_al = _round_up(B, align)
    fixed_bytes = (D_in * Hp + Hp * Hp) * w_isz + 16 * Hp * 4
    per_row = 2 * D_in * x_isz + 2 * 4 + 8 * Hp * 4   # x/out dbuf + live (tb,Hp)
    budget = int(0.6 * vmem_cap)
    tb_cap = max(align, (budget - fixed_bytes) // per_row)
    if tb is None:
        if B_al <= min(tb_cap, 2048):
            tb = B_al                         # whole batch, grid=(1,): no per-step overhead
        else:
            # Large batch: MXU-friendly M tile, >=2 grid steps so v7x's two
            # TensorCores both get work via the "parallel" grid axis.
            tb = min(tb_cap, 1024)
            tb = max(128, tb // 128 * 128)
    tb = _round_up(max(align, min(tb, max(B_al, align))), align)
    B_pad = _round_up(B_al, tb)
    grid = (B_pad // tb,)

    if B_pad != B:
        x = jnp.pad(x, ((0, B_pad - B), (0, 0)))
    x = x.astype(jnp.bfloat16) if use_bf16 else x.astype(f32)

    # ---- parameter prep: pad H -> Hp with zeros, fold second Linear + head --
    def pad_h(a):
        return jnp.pad(a, [(0, 0)] * (a.ndim - 1) + [(0, Hp - H)])

    wdt = jnp.bfloat16 if use_bf16 else f32
    w1 = pad_h(params["w1"]).astype(wdt)                                   # (D_in, Hp)
    wa = jnp.pad(params["res_wa"], ((0, Hp - H), (0, Hp - H))).astype(wdt)  # (Hp, Hp)

    #   out = h1 @ w_out + relu(LN_b(.)) @ (res_wb @ w_out) + (res_bb @ w_out + b_out)
    wo_fold = params["res_wb"] @ params["w_out"]                # (H, 1)
    c = params["res_bb"] @ params["w_out"] + params["b_out"]    # (1, 1)

    vec = jnp.concatenate([
        pad_h(params["b1"]),
        pad_h(params["ln1_g"]), pad_h(params["ln1_b"]),
        pad_h(params["res_lna_g"]), pad_h(params["res_lna_b"]),
        pad_h(params["res_ba"]),
        pad_h(params["res_lnb_g"]), pad_h(params["res_lnb_b"]),
        pad_h(params["w_out"].reshape(1, H)),
        pad_h(wo_fold.reshape(1, H)),
        jnp.broadcast_to(c, (1, Hp)),
    ], axis=0).astype(f32)                                      # (11, Hp)

    def const_spec(shape):
        # Grid-invariant parameter: fetched once; single-buffer halves its VMEM.
        n = len(shape)
        return pl.BlockSpec(shape, lambda i, _n=n: (0,) * _n,
                            pipeline_mode=pl.Buffered(1))

    in_specs = [
        pl.BlockSpec((tb, D_in), lambda i: (i, 0)),   # streamed x tile
        const_spec((D_in, Hp)),                       # w1
        const_spec((Hp, Hp)),                         # residual wa
        const_spec((11, Hp)),                         # packed biases / LN / head
    ]
    out_spec = pl.BlockSpec((tb, 1), lambda i: (i, 0))

    vmem_est = (2 * tb * D_in * x_isz + 2 * tb * 4
                + (D_in * Hp + Hp * Hp) * w_isz + 16 * Hp * 4
                + 8 * tb * Hp * 4)
    vmem_limit = int(min(int(0.75 * vmem_cap),
                         max(32 * 1024 * 1024, 2 * vmem_est)))

    flops = int(2 * B_pad * (D_in * Hp + Hp * Hp) + 30 * B_pad * Hp)
    bytes_accessed = int(B_pad * D_in * x_isz
                         + (D_in * Hp + Hp * Hp) * w_isz + 11 * Hp * 4
                         + B_pad * 4)
    cost = pl.CostEstimate(flops=flops, transcendentals=int(3 * B_pad),
                           bytes_accessed=bytes_accessed)

    out = pl.pallas_call(
        functools.partial(classifier_kernel, inv_h=1.0 / H),
        out_shape=jax.ShapeDtypeStruct((B_pad, 1), f32),
        grid_spec=pltpu.PrefetchScalarGridSpec(
            num_scalar_prefetch=0,
            grid=grid,
            in_specs=in_specs,
            out_specs=out_spec,
        ),
        compiler_params=pltpu.CompilerParams(
            dimension_semantics=("parallel",),
            vmem_limit_bytes=vmem_limit,
        ),
        cost_estimate=cost,
    )(x, w1, wa, vec)
    return out[:B]


def init_params(key, input_dim, hidden_dim):
    """Deterministic synthetic parameters (PyTorch Linear weights pre-transposed)."""
    ks = jax.random.split(key, 8)
    f32 = jnp.float32
    return {
        "w1": jax.random.normal(ks[0], (input_dim, hidden_dim), f32) * 0.05,
        "b1": jax.random.normal(ks[1], (1, hidden_dim), f32) * 0.05,
        "ln1_g": jnp.ones((1, hidden_dim), f32),
        "ln1_b": jnp.zeros((1, hidden_dim), f32),
        "res_lna_g": jnp.ones((1, hidden_dim), f32),
        "res_lna_b": jnp.zeros((1, hidden_dim), f32),
        "res_wa": jax.random.normal(ks[2], (hidden_dim, hidden_dim), f32) * 0.05,
        "res_ba": jax.random.normal(ks[3], (1, hidden_dim), f32) * 0.05,
        "res_lnb_g": jnp.ones((1, hidden_dim), f32),
        "res_lnb_b": jnp.zeros((1, hidden_dim), f32),
        "res_wb": jax.random.normal(ks[4], (hidden_dim, hidden_dim), f32) * 0.05,
        "res_bb": jax.random.normal(ks[5], (1, hidden_dim), f32) * 0.05,
        "w_out": jax.random.normal(ks[6], (hidden_dim, 1), f32) * 0.05,
        "b_out": jax.random.normal(ks[7], (1, 1), f32) * 0.05,
    }


def _ln_ref(h, gamma, beta):
    mu = jnp.mean(h, axis=-1, keepdims=True)
    var = jnp.mean((h - mu) ** 2, axis=-1, keepdims=True)
    return (h - mu) * lax.rsqrt(var + LN_EPS) * gamma + beta


def reference_forward(x, p):
    """Pure-JAX reference mirroring the PyTorch module (eval mode)."""
    h = x @ p["w1"] + p["b1"]
    h = jnp.maximum(_ln_ref(h, p["ln1_g"], p["ln1_b"]), 0.0)
    r = jnp.maximum(_ln_ref(h, p["res_lna_g"], p["res_lna_b"]), 0.0)
    r = r @ p["res_wa"] + p["res_ba"]
    r = jnp.maximum(_ln_ref(r, p["res_lnb_g"], p["res_lnb_b"]), 0.0)
    r = r @ p["res_wb"] + p["res_bb"]
    h = h + r
    return h @ p["w_out"] + p["b_out"]


if __name__ == "__main__":
    # TODO(synk): Dropout is modeled as identity (inference mode); training-mode
    # stochastic dropout would need pltpu.prng_* inside the kernel.
    key = jax.random.PRNGKey(0)
    k_x, k_p = jax.random.split(key)

    batch, input_dim, hidden_dim = 16, 32, 64
    x = jax.random.normal(k_x, (batch, input_dim), jnp.float32)
    params = init_params(k_p, input_dim, hidden_dim)
    ref = reference_forward(x, params)

    # f32 matmul path (tolerance loosened slightly: folded head + E[x^2]-mu^2
    # LayerNorm are f32 reassociations of the reference math).
    out_f32 = jax.block_until_ready(classifier_forward(x, params, use_bf16=False))
    assert out_f32.shape == (batch, 1), out_f32.shape
    assert jnp.allclose(out_f32, ref, atol=1e-3, rtol=1e-3), (
        float(jnp.max(jnp.abs(out_f32 - ref)))
    )

    # bf16-matmul fast path (bf16 x/weights, f32 accumulation + f32 LayerNorm).
    out_bf16 = jax.block_until_ready(classifier_forward(x, params, use_bf16=True))
    assert out_bf16.shape == (batch, 1), out_bf16.shape
    assert jnp.allclose(out_bf16, ref, atol=5e-2, rtol=5e-2), (
        float(jnp.max(jnp.abs(out_bf16 - ref)))
    )

    # Batch not divisible by the tile/alignment -> exercises the padding path.
    x2 = jax.random.normal(k_x, (batch + 3, input_dim), jnp.float32)
    out2 = jax.block_until_ready(classifier_forward(x2, params, use_bf16=False))
    ref2 = reference_forward(x2, params)
    assert out2.shape == (batch + 3, 1), out2.shape
    assert jnp.allclose(out2, ref2, atol=1e-3, rtol=1e-3), (
        float(jnp.max(jnp.abs(out2 - ref2)))
    )

    print("KERNEL_OK")
</pallas_src>

<mosaic_0001>
module attributes {stable_mosaic.version = 11 : i64} {
  func.func @classifier_kernel(%arg0: i32, %arg1: memref<16x32xf32, #tpu.memory_space<vmem>>, %arg2: memref<32x128xf32, #tpu.memory_space<vmem>>, %arg3: memref<128x128xf32, #tpu.memory_space<vmem>>, %arg4: memref<11x128xf32, #tpu.memory_space<vmem>>, %arg5: memref<16x1xf32, #tpu.memory_space<vmem>>) attributes {dimension_semantics = [#tpu.dimension_semantics<parallel>], iteration_bounds = array<i64: 1>, scalar_prefetch = 0 : i64, scratch_operands = 0 : i64, tpu.core_type = #tpu.core_type<tc>, window_params = [{transform_indices = @transform_0, window_bounds = array<i64: 16, 32>}, {pipeline_mode = #tpu.pipeline_mode<synchronous>, transform_indices = @transform_1, window_bounds = array<i64: 32, 128>}, {pipeline_mode = #tpu.pipeline_mode<synchronous>, transform_indices = @transform_2, window_bounds = array<i64: 128, 128>}, {pipeline_mode = #tpu.pipeline_mode<synchronous>, transform_indices = @transform_3, window_bounds = array<i64: 11, 128>}, {transform_indices = @transform_4, window_bounds = array<i64: 16, 1>}]} {
    %c0 = arith.constant 0 : index
    %c0_0 = arith.constant 0 : index
    %0 = vector.load %arg4[%c0, %c0_0] : memref<11x128xf32, #tpu.memory_space<vmem>>, vector<11x128xf32>
    %1 = vector.extract_strided_slice %0 {offsets = [0, 0], sizes = [1, 128], strides = [1, 1]} : vector<11x128xf32> to vector<1x128xf32>
    %2 = vector.extract_strided_slice %0 {offsets = [1, 0], sizes = [1, 128], strides = [1, 1]} : vector<11x128xf32> to vector<1x128xf32>
    %3 = vector.extract_strided_slice %0 {offsets = [2, 0], sizes = [1, 128], strides = [1, 1]} : vector<11x128xf32> to vector<1x128xf32>
    %4 = vector.extract_strided_slice %0 {offsets = [3, 0], sizes = [1, 128], strides = [1, 1]} : vector<11x128xf32> to vector<1x128xf32>
    %5 = vector.extract_strided_slice %0 {offsets = [4, 0], sizes = [1, 128], strides = [1, 1]} : vector<11x128xf32> to vector<1x128xf32>
    %6 = vector.extract_strided_slice %0 {offsets = [5, 0], sizes = [1, 128], strides = [1, 1]} : vector<11x128xf32> to vector<1x128xf32>
    %7 = vector.extract_strided_slice %0 {offsets = [6, 0], sizes = [1, 128], strides = [1, 1]} : vector<11x128xf32> to vector<1x128xf32>
    %8 = vector.extract_strided_slice %0 {offsets = [7, 0], sizes = [1, 128], strides = [1, 1]} : vector<11x128xf32> to vector<1x128xf32>
    %9 = vector.extract_strided_slice %0 {offsets = [8, 0], sizes = [1, 128], strides = [1, 1]} : vector<11x128xf32> to vector<1x128xf32>
    %10 = vector.extract_strided_slice %0 {offsets = [9, 0], sizes = [1, 128], strides = [1, 1]} : vector<11x128xf32> to vector<1x128xf32>
    %11 = vector.extract_strided_slice %0 {offsets = [10, 0], sizes = [1, 1], strides = [1, 1]} : vector<11x128xf32> to vector<1x1xf32>
    %c0_1 = arith.constant 0 : index
    %c0_2 = arith.constant 0 : index
    %12 = vector.load %arg1[%c0_1, %c0_2] : memref<16x32xf32, #tpu.memory_space<vmem>>, vector<16x32xf32>
    %c0_3 = arith.constant 0 : index
    %c0_4 = arith.constant 0 : index
    %13 = vector.load %arg2[%c0_3, %c0_4] : memref<32x128xf32, #tpu.memory_space<vmem>>, vector<32x128xf32>
    %cst = arith.constant dense<0.000000e+00> : vector<16x128xf32>
    %14 = tpu.matmul %12, %13, %cst {dimension_numbers = #tpu.dot_dimension_numbers<[1], [0], [0], [1], [0, 0, 1, 1], [], []>} : vector<16x32xf32>, vector<32x128xf32>, vector<16x128xf32> -> vector<16x128xf32>
    %15 = vector.broadcast %1 : vector<1x128xf32> to vector<16x128xf32>
    %16 = arith.addf %14, %15 : vector<16x128xf32>
    %cst_5 = arith.constant dense<0.000000e+00> : vector<16xf32>
    %17 = vector.multi_reduction <add>, %16, %cst_5 [1] : vector<16x128xf32> to vector<16xf32>
    %18 = vector.shape_cast %17 : vector<16xf32> to vector<16x1xf32>
    %cst_6 = arith.constant 1.562500e-02 : f32
    %19 = vector.broadcast %cst_6 : f32 to vector<16x1xf32>
    %20 = arith.mulf %18, %19 : vector<16x1xf32>
    %21 = arith.mulf %16, %16 : vector<16x128xf32>
    %cst_7 = arith.constant dense<0.000000e+00> : vector<16xf32>
    %22 = vector.multi_reduction <add>, %21, %cst_7 [1] : vector<16x128xf32> to vector<16xf32>
    %23 = vector.shape_cast %22 : vector<16xf32> to vector<16x1xf32>
    %cst_8 = arith.constant 1.562500e-02 : f32
    %24 = vector.broadcast %cst_8 : f32 to vector<16x1xf32>
    %25 = arith.mulf %23, %24 : vector<16x1xf32>
    %26 = arith.mulf %20, %20 : vector<16x1xf32>
    %27 = arith.subf %25, %26 : vector<16x1xf32>
    %cst_9 = arith.constant 9.99999974E-6 : f32
    %28 = vector.broadcast %cst_9 : f32 to vector<16x1xf32>
    %29 = arith.addf %27, %28 : vector<16x1xf32>
    %30 = math.rsqrt %29 : vector<16x1xf32>
    %31 = vector.broadcast %2 : vector<1x128xf32> to vector<16x128xf32>
    %32 = vector.broadcast %30 : vector<16x1xf32> to vector<16x128xf32>
    %33 = arith.mulf %31, %32 : vector<16x128xf32>
    %34 = arith.mulf %16, %33 : vector<16x128xf32>
    %35 = vector.broadcast %20 : vector<16x1xf32> to vector<16x128xf32>
    %36 = arith.mulf %35, %33 : vector<16x128xf32>
    %37 = vector.broadcast %3 : vector<1x128xf32> to vector<16x128xf32>
    %38 = arith.subf %37, %36 : vector<16x128xf32>
    %39 = arith.addf %34, %38 : vector<16x128xf32>
    %cst_10 = arith.constant 0.000000e+00 : f32
    %40 = vector.broadcast %cst_10 : f32 to vector<16x128xf32>
    %41 = arith.maximumf %39, %40 : vector<16x128xf32>
    %42 = vector.broadcast %9 : vector<1x128xf32> to vector<16x128xf32>
    %43 = arith.mulf %41, %42 : vector<16x128xf32>
    %cst_11 = arith.constant dense<0.000000e+00> : vector<16xf32>
    %44 = vector.multi_reduction <add>, %43, %cst_11 [1] : vector<16x128xf32> to vector<16xf32>
    %45 = vector.shape_cast %44 : vector<16xf32> to vector<16x1xf32>
    %cst_12 = arith.constant dense<0.000000e+00> : vector<16xf32>
    %46 = vector.multi_reduction <add>, %41, %cst_12 [1] : vector<16x128xf32> to vector<16xf32>
    %47 = vector.shape_cast %46 : vector<16xf32> to vector<16x1xf32>
    %cst_13 = arith.constant 1.562500e-02 : f32
    %48 = vector.broadcast %cst_13 : f32 to vector<16x1xf32>
    %49 = arith.mulf %47, %48 : vector<16x1xf32>
    %50 = arith.mulf %41, %41 : vector<16x128xf32>
    %cst_14 = arith.constant dense<0.000000e+00> : vector<16xf32>
    %51 = vector.multi_reduction <add>, %50, %cst_14 [1] : vector<16x128xf32> to vector<16xf32>
    %52 = vector.shape_cast %51 : vector<16xf32> to vector<16x1xf32>
    %cst_15 = arith.constant 1.562500e-02 : f32
    %53 = vector.broadcast %cst_15 : f32 to vector<16x1xf32>
    %54 = arith.mulf %52, %53 : vector<16x1xf32>
    %55 = arith.mulf %49, %49 : vector<16x1xf32>
    %56 = arith.subf %54, %55 : vector<16x1xf32>
    %cst_16 = arith.constant 9.99999974E-6 : f32
    %57 = vector.broadcast %cst_16 : f32 to vector<16x1xf32>
    %58 = arith.addf %56, %57 : vector<16x1xf32>
    %59 = math.rsqrt %58 : vector<16x1xf32>
    %60 = vector.broadcast %4 : vector<1x128xf32> to vector<16x128xf32>
    %61 = vector.broadcast %59 : vector<16x1xf32> to vector<16x128xf32>
    %62 = arith.mulf %60, %61 : vector<16x128xf32>
    %63 = arith.mulf %41, %62 : vector<16x128xf32>
    %64 = vector.broadcast %49 : vector<16x1xf32> to vector<16x128xf32>
    %65 = arith.mulf %64, %62 : vector<16x128xf32>
    %66 = vector.broadcast %5 : vector<1x128xf32> to vector<16x128xf32>
    %67 = arith.subf %66, %65 : vector<16x128xf32>
    %68 = arith.addf %63, %67 : vector<16x128xf32>
    %cst_17 = arith.constant 0.000000e+00 : f32
    %69 = vector.broadcast %cst_17 : f32 to vector<16x128xf32>
    %70 = arith.maximumf %68, %69 : vector<16x128xf32>
    %c0_18 = arith.constant 0 : index
    %c0_19 = arith.constant 0 : index
    %71 = vector.load %arg3[%c0_18, %c0_19] : memref<128x128xf32, #tpu.memory_space<vmem>>, vector<128x128xf32>
    %cst_20 = arith.constant dense<0.000000e+00> : vector<16x128xf32>
    %72 = tpu.matmul %70, %71, %cst_20 {dimension_numbers = #tpu.dot_dimension_numbers<[1], [0], [0], [1], [0, 0, 1, 1], [], []>} : vector<16x128xf32>, vector<128x128xf32>, vector<16x128xf32> -> vector<16x128xf32>
    %73 = vector.broadcast %6 : vector<1x128xf32> to vector<16x128xf32>
    %74 = arith.addf %72, %73 : vector<16x128xf32>
    %cst_21 = arith.constant dense<0.000000e+00> : vector<16xf32>
    %75 = vector.multi_reduction <add>, %74, %cst_21 [1] : vector<16x128xf32> to vector<16xf32>
    %76 = vector.shape_cast %75 : vector<16xf32> to vector<16x1xf32>
    %cst_22 = arith.constant 1.562500e-02 : f32
    %77 = vector.broadcast %cst_22 : f32 to vector<16x1xf32>
    %78 = arith.mulf %76, %77 : vector<16x1xf32>
    %79 = arith.mulf %74, %74 : vector<16x128xf32>
    %cst_23 = arith.constant dense<0.000000e+00> : vector<16xf32>
    %80 = vector.multi_reduction <add>, %79, %cst_23 [1] : vector<16x128xf32> to vector<16xf32>
    %81 = vector.shape_cast %80 : vector<16xf32> to vector<16x1xf32>
    %cst_24 = arith.constant 1.562500e-02 : f32
    %82 = vector.broadcast %cst_24 : f32 to vector<16x1xf32>
    %83 = arith.mulf %81, %82 : vector<16x1xf32>
    %84 = arith.mulf %78, %78 : vector<16x1xf32>
    %85 = arith.subf %83, %84 : vector<16x1xf32>
    %cst_25 = arith.constant 9.99999974E-6 : f32
    %86 = vector.broadcast %cst_25 : f32 to vector<16x1xf32>
    %87 = arith.addf %85, %86 : vector<16x1xf32>
    %88 = math.rsqrt %87 : vector<16x1xf32>
    %89 = vector.broadcast %7 : vector<1x128xf32> to vector<16x128xf32>
    %90 = vector.broadcast %88 : vector<16x1xf32> to vector<16x128xf32>
    %91 = arith.mulf %89, %90 : vector<16x128xf32>
    %92 = arith.mulf %74, %91 : vector<16x128xf32>
    %93 = vector.broadcast %78 : vector<16x1xf32> to vector<16x128xf32>
    %94 = arith.mulf %93, %91 : vector<16x128xf32>
    %95 = vector.broadcast %8 : vector<1x128xf32> to vector<16x128xf32>
    %96 = arith.subf %95, %94 : vector<16x128xf32>
    %97 = arith.addf %92, %96 : vector<16x128xf32>
    %cst_26 = arith.constant 0.000000e+00 : f32
    %98 = vector.broadcast %cst_26 : f32 to vector<16x128xf32>
    %99 = arith.maximumf %97, %98 : vector<16x128xf32>
    %100 = vector.broadcast %10 : vector<1x128xf32> to vector<16x128xf32>
    %101 = arith.mulf %99, %100 : vector<16x128xf32>
    %cst_27 = arith.constant dense<0.000000e+00> : vector<16xf32>
    %102 = vector.multi_reduction <add>, %101, %cst_27 [1] : vector<16x128xf32> to vector<16xf32>
    %103 = vector.shape_cast %102 : vector<16xf32> to vector<16x1xf32>
    %104 = arith.addf %45, %103 : vector<16x1xf32>
    %105 = vector.broadcast %11 : vector<1x1xf32> to vector<16x1xf32>
    %106 = arith.addf %104, %105 : vector<16x1xf32>
    %c0_28 = arith.constant 0 : index
    %c0_29 = arith.constant 0 : index
    %107 = vector.load %arg5[%c0_28, %c0_29] : memref<16x1xf32, #tpu.memory_space<vmem>>, vector<16x1xf32>
    tpu.vector_store %arg5[%c0_28, %c0_29], %106 {strides = array<i32>} : memref<16x1xf32, #tpu.memory_space<vmem>>, vector<16x1xf32>,
    return
  }
  func.func @transform_0(%arg0: i32) -> (i32, i32) {
    %c0_i32 = arith.constant 0 : i32
    %c0_i32_0 = arith.constant 0 : i32
    return %arg0, %c0_i32 : i32, i32
  }
  func.func @transform_1(%arg0: i32) -> (i32, i32) {
    %c0_i32 = arith.constant 0 : i32
    %c0_i32_0 = arith.constant 0 : i32
    %c0_i32_1 = arith.constant 0 : i32
    return %c0_i32, %c0_i32_0 : i32, i32
  }
  func.func @transform_2(%arg0: i32) -> (i32, i32) {
    %c0_i32 = arith.constant 0 : i32
    %c0_i32_0 = arith.constant 0 : i32
    %c0_i32_1 = arith.constant 0 : i32
    return %c0_i32, %c0_i32_0 : i32, i32
  }
  func.func @transform_3(%arg0: i32) -> (i32, i32) {
    %c0_i32 = arith.constant 0 : i32
    %c0_i32_0 = arith.constant 0 : i32
    %c0_i32_1 = arith.constant 0 : i32
    return %c0_i32, %c0_i32_0 : i32, i32
  }
  func.func @transform_4(%arg0: i32) -> (i32, i32) {
    %c0_i32 = arith.constant 0 : i32
    %c0_i32_0 = arith.constant 0 : i32
    return %arg0, %c0_i32 : i32, i32
  }
}

</mosaic_0001>

<bundles_post_ra>
// kernel: tpu_custom_call.1
= control target key start
LH: loop header
LB: loop body
LE: loop exit
PB: predicated region body
PF: predicated region fallthrough
CT: control target
= control target key end

     0   :  { %9 = vsyncpa [#allocation3], 0  ;;  %s566_s0 = inlined_call_operand.hbm [shape: f32[16,32], index: 0, kind: input, shape index: {}]   ;;  %s567_s1 = inlined_call_operand.hbm [shape: f32[32,128], index: 1, kind: input, shape index: {}]   ;;  %s568_s2 = inlined_call_operand.hbm [shape: f32[128,128], index: 2, kind: input, shape index: {}]   ;;  %s569_s3 = inlined_call_operand.hbm [shape: f32[11,128], index: 3, kind: input, shape index: {}]   ;;  %s570_s4 = inlined_call_operand.vmem [shape: f32[16,1], index: 4, kind: output, shape index: {}]  }
   0x1   :  { %10 = vsyncpa [#allocation5], 0 }
   0x2   :  { %11 = vsyncpa [#allocation8], 0  ;;  %s29_s17 = sshll.u32 %s567_s1, 4  ;;  %s488_s18 = smov [#allocation4]   ;;  %s30_s17 = int_to_ptr.hbm [resolvable:$true] %s29_s17 }
   0x3   :  { %s31_s19 = sshll.u32 %s488_s18, 4  ;;  %s16_s22 = sshll.u32 %s566_s0, 4  ;;  %s32_s19 = int_to_ptr.vmem [resolvable:$true] %s31_s19  ;;  %s17_s22 = int_to_ptr.hbm [resolvable:$true] %s16_s22 }
   0x4   :  { %s489_s23 = smov 128   ;;  %s490_s24 = smov 8  }
   0x5   :  { %37 = dma.hbm_to_vmem [thread:$0]  %s30_s17, 512, %s32_s19, [#allocation5], %s489_s23, %s489_s23, %s490_s24  }
   0x6   :  { %s491_s25 = smov [#allocation2]   ;;  %s42_s29 = sshll.u32 %s568_s2, 4  ;;  %s43_s29 = int_to_ptr.hbm [resolvable:$true] %s42_s29 }
   0x7   :  { %s18_s26 = sshll.u32 %s491_s25, 4  ;;  %s55_s5 = sshll.u32 %s569_s3, 4  ;;  %s19_s26 = int_to_ptr.vmem [resolvable:$true] %s18_s26  ;;  %s56_s5 = int_to_ptr.hbm [resolvable:$true] %s55_s5 }
   0x8   :  { %24 = dma.hbm_to_vmem [thread:$0]  %s17_s22, 256, %s19_s26, [#allocation3], %s489_s23, %s489_s23, %s490_s24  }
   0x9   :  { %s492_s6 = smov [#allocation6]   ;;  %s493_s0 = smov [#allocation7]  }
   0xa   :  { %s44_s7 = sshll.u32 %s492_s6, 4  ;;  %s57_s8 = sshll.u32 %s493_s0, 4  ;;  %s45_s7 = int_to_ptr.vmem [resolvable:$true] %s44_s7  ;;  %s58_s8 = int_to_ptr.vmem [resolvable:$true] %s57_s8 }
   0xb   :  { %50 = dma.hbm_to_vmem [thread:$0]  %s43_s29, 2048, %s45_s7, [#allocation5], %s489_s23, %s489_s23, %s490_s24  }
   0xc   :  { %63 = dma.hbm_to_vmem [thread:$0]  %s56_s5, 256, %s58_s8, [#allocation8], %s489_s23, %s489_s23, %s490_s24  }
   0xd   :  { %482 = dma.done.wait [#allocation3], 256  }
   0xe   :  { %483 = vsyncadd [#allocation3], 4294967040 }
   0xf   :  { %484 = dma.done.wait [#allocation5], 2560  }
  0x10   :  { %485 = vsyncadd [#allocation5], 4294964736 }
  0x11   :  { %486 = dma.done.wait [#allocation8], 256  }
  0x12   :  { %487 = vsyncadd [#allocation8], 4294967040  ;;  %v87_v0 = vld [vmem:[#allocation4 + $0x18] sm:$0xff]  ;;  %v86_v1 = vld [vmem:[#allocation4 + $0x10] sm:$0xff]  ;;  %vm89_vm0 = vcmask 261120  }
  0x13   :  { %108 = vmatpush.msra.mxu0 %v87_v0  ;;  %v85_v2 = vld [vmem:[#allocation4 + $0x8] sm:$0xff]  ;;  %v84_v3 = vld [vmem:[#allocation4] sm:$0xff]  ;;  %v82_v4 = vld [vmem:[#allocation2] sm:$0xff] }
  0x14   :  { %v83_v5 = vld [vmem:[#allocation2 + $0x8] sm:$0xff]  ;;  %v531_v6 = vld [vmem:[#allocation7] sm:$0xff]  ;;  %v248_v59 = vld [vmem:[#allocation6 + $0x70] sm:$0xff] }
  0x15   :  { %109 = vmatpush.msra.mxu0 %v86_v1  ;;  %v88_v7 = vperm.slane %v531_v6, 0  ;;  %v159_v34 = vperm.slane %v531_v6, 1  ;;  %v166_v40 = vperm.slane %v531_v6, 2  ;;  %v249_v58 = vld [vmem:[#allocation6 + $0x78] sm:$0xff]  ;;  %v247_v60 = vld [vmem:[#allocation6 + $0x68] sm:$0xff]  ;;  %v246_v61 = vld [vmem:[#allocation6 + $0x60] sm:$0xff] }
  0x16   :  { %251 = vmatpush.msra.mxu1 %v249_v58  ;;  %352 = vmatpush.msra.mxu2 %v249_v58  ;;  %v245_v62 = vld [vmem:[#allocation6 + $0x58] sm:$0xff]  ;;  %v244_v63 = vld [vmem:[#allocation6 + $0x50] sm:$0xff]  ;;  %v243_v0 = vld [vmem:[#allocation6 + $0x48] sm:$0xff] }
  0x17   :  { %110 = vmatpush.msra.mxu0 %v85_v2  ;;  %v242_v1 = vld [vmem:[#allocation6 + $0x40] sm:$0xff]  ;;  %v241_v2 = vld [vmem:[#allocation6 + $0x38] sm:$0xff] }
  0x18   :  { %252 = vmatpush.msra.mxu1 %v248_v59  ;;  %353 = vmatpush.msra.mxu2 %v248_v59  ;;  %v551_v59 = vld [vmem:[#allocation7 + $0x8] sm:$0x7] }
  0x19   :  { %111 = vmatpush.msra.mxu0 %v84_v3  ;;  %v240_v3 = vld [vmem:[#allocation6 + $0x30] sm:$0xff] }
  0x1a   :  { %350 = vmatmul.msk.f32.vlgmr.msra.gmra.mxu0 %vm89_vm0, %v82_v4  ;;  %253 = vmatpush.msra.mxu1 %v247_v60  ;;  %v239_v4 = vld [vmem:[#allocation6 + $0x28] sm:$0xff] }
  0x1b   :  { %354 = vmatpush.msra.mxu2 %v247_v60  ;;  %v173_v60 = vperm.slane %v551_v59, 0 }
  0x1c   :  { %254 = vmatpush.msra.mxu1 %v246_v61 }
  0x1d   :  { %355 = vmatpush.msra.mxu2 %v246_v61 }
  0x1e   :  { %255 = vmatpush.msra.mxu1 %v245_v62 }
  0x1f   :  { %356 = vmatpush.msra.mxu2 %v245_v62 }
  0x20   :  { %256 = vmatpush.msra.mxu1 %v244_v63 }
  0x21   :  { %357 = vmatpush.msra.mxu2 %v244_v63 }
  0x22   :  { %351 = vmatmul.msk.f32.gmra.mxu0 %vm89_vm0, %v83_v5  ;;  %257 = vmatpush.msra.mxu1 %v243_v0  ;;  %v238_v5 = vld [vmem:[#allocation6 + $0x20] sm:$0xff] }
  0x23   :  { %358 = vmatpush.msra.mxu2 %v243_v0 }
  0x24   :  { %258 = vmatpush.msra.mxu1 %v242_v1 }
  0x25   :  { %359 = vmatpush.msra.mxu2 %v242_v1 }
  0x26   :  { %259 = vmatpush.msra.mxu1 %v241_v2 }
  0x27   :  { %360 = vmatpush.msra.mxu2 %v241_v2 }
  0x28   :  { %260 = vmatpush.msra.mxu1 %v240_v3 }
  0x29   :  { %361 = vmatpush.msra.mxu2 %v240_v3 }
  0x2a   :  { %261 = vmatpush.msra.mxu1 %v239_v4 }
  0x2b   :  { %362 = vmatpush.msra.mxu2 %v239_v4 }
  0x2c   :  { %262 = vmatpush.msra.mxu1 %v238_v5 }
  0x2d   :  { %363 = vmatpush.msra.mxu2 %v238_v5 }
  0x97   :  { %v113_v8 = vpop.f32.mrf.mxu0 }
  0x98   :  { %v114_v9 = vadd.f32 %v113_v8, %v88_v7  ;;  %v236_v8 = vld [vmem:[#allocation6 + $0x10] sm:$0xff] }
  0x9a   :  { %119 = vadd.xlane.f32.xlu1 %v114_v9  ;;  %v125_v12 = vmul.f32 %v114_v9, %v114_v9 }
  0x9f   :  { %v116_v10 = vpop.f32.mrf.mxu0 }
  0xa0   :  { %v117_v11 = vadd.f32 %v116_v10, %v88_v7  ;;  %v237_v7 = vld [vmem:[#allocation6 + $0x18] sm:$0xff] }
  0xa1   :  { %263 = vmatpush.msra.mxu1 %v237_v7  ;;  %364 = vmatpush.msra.mxu2 %v237_v7 }
  0xa2   :  { %121 = vadd.xlane.f32.xlu0 %v117_v11  ;;  %127 = vadd.xlane.f32.xlu1 %v125_v12  ;;  %v126_v13 = vmul.f32 %v117_v11, %v117_v11 }
  0xa3   :  { %264 = vmatpush.msra.mxu1 %v236_v8  ;;  %365 = vmatpush.msra.mxu2 %v236_v8 }
  0xaa   :  { %129 = vadd.xlane.f32.xlu0 %v126_v13 }
 0x10d   :  { %v120_v14 = vpop.xlane.xlu1 %119 }
 0x10e   :  { %v123_v15 = vmul.f32 0.015625, %v120_v14 }
 0x110   :  { %v133_v18 = vmul.f32 %v123_v15, %v123_v15 }
 0x115   :  { %v122_v16 = vpop.xlane.xlu0 %121  ;;  %v128_v17 = vpop.xlane.xlu1 %127 }
 0x116   :  { %v131_v19 = vmul.f32 0.015625, %v128_v17  ;;  %v124_v21 = vmul.f32 0.015625, %v122_v16 }
 0x118   :  { %v135_v20 = vsub.f32 %v131_v19, %v133_v18  ;;  %v134_v24 = vmul.f32 %v124_v21, %v124_v21 }
 0x11a   :  { %v137_v22 = vadd.f32 1e-05, %v135_v20 }
 0x11c   :  { %374 = vrsqrt.f32 %v137_v22  ;;  %vm145_vm2 = vweird.f32 %v137_v22 }
 0x11d   :  { %v130_v23 = vpop.xlane.xlu0 %129 }
 0x11e   :  { %v132_v25 = vmul.f32 0.015625, %v130_v23 }
 0x120   :  { %v136_v26 = vsub.f32 %v132_v25, %v134_v24 }
 0x122   :  { %v375_v27 = vpop.eup %374  ;;  %v138_v28 = vadd.f32 1e-05, %v136_v26 }
 0x123   :  { %v140_v29 = vmul.f32 %v375_v27, %v137_v22  ;;  %vm146_vm1 = vweird.f32 %v375_v27 }
 0x124   :  { %376 = vrsqrt.f32 %v138_v28  ;;  %vm147_vm3 = vmor %vm145_vm2, %vm146_vm1  ;;  %vm155_vm5 = vweird.f32 %v138_v28 }
 0x125   :  { %v141_v30 = vmul.f32 %v375_v27, %v140_v29 }
 0x127   :  { %v142_v31 = vmul.f32 0.5, %v141_v30  ;;  %v220_v30 = vperm.slane %v531_v6, 3 }
 0x129   :  { %v143_v32 = vsub.f32 1.5, %v142_v31 }
 0x12a   :  { %v377_v33 = vpop.eup %376 }
 0x12b   :  { %v144_v35 = vmul.f32 %v375_v27, %v143_v32  ;;  %v150_v36 = vmul.f32 %v377_v33, %v138_v28  ;;  %vm156_vm4 = vweird.f32 %v377_v33 }
 0x12c   :  { %vm157_vm6 = vmor %vm155_vm5, %vm156_vm4 }
 0x12d   :  { %v148_v37 = vsel %vm147_vm3, %v375_v27, %v144_v35  ;;  %v151_v38 = vmul.f32 %v377_v33, %v150_v36  ;;  %vm340_vm3 = vcmask 7168  }
 0x12e   :  { %v160_v39 = vmul.f32 %v159_v34, %v148_v37 }
 0x12f   :  { %v152_v41 = vmul.f32 0.5, %v151_v38 }
 0x130   :  { %v164_v42 = vmul.f32 %v160_v39, %v123_v15  ;;  %v162_v44 = vmul.f32 %v160_v39, %v114_v9  ;;  %v234_v15 = vld [vmem:[#allocation6] sm:$0xff] }
 0x131   :  { %v153_v43 = vsub.f32 1.5, %v152_v41 }
 0x132   :  { %v167_v45 = vsub.f32 %v166_v40, %v164_v42 }
 0x133   :  { %v154_v46 = vmul.f32 %v377_v33, %v153_v43 }
 0x134   :  { %v169_v47 = vadd.f32 %v167_v45, %v162_v44 }
 0x135   :  { %v158_v48 = vsel %vm157_vm6, %v377_v33, %v154_v46 }
 0x136   :  { %v161_v49 = vmul.f32 %v159_v34, %v158_v48  ;;  %v536_v50 = vmax.f32 %v169_v47, 0.0  ;;  %v227_v34 = vperm.slane %v531_v6, 4 }
 0x138   :  { %180 = vadd.xlane.f32.xlu0 %v536_v50  ;;  %v186_v51 = vmul.f32 %v536_v50, %v536_v50  ;;  %v165_v52 = vmul.f32 %v161_v49, %v124_v21  ;;  %v163_v53 = vmul.f32 %v161_v49, %v117_v11  ;;  %v235_v11 = vld [vmem:[#allocation6 + $0x8] sm:$0xff]  ;;  %v174_v1 = vmul.f32 %v173_v60, %v536_v50 }
 0x139   :  { %265 = vmatpush.msra.mxu1 %v235_v11  ;;  %366 = vmatpush.msra.mxu2 %v235_v11 }
 0x13a   :  { %188 = vadd.xlane.f32.xlu1 %v186_v51  ;;  %v168_v54 = vsub.f32 %v166_v40, %v165_v52 }
 0x13b   :  { %266 = vmatpush.msra.mxu1 %v234_v15  ;;  %367 = vmatpush.msra.mxu2 %v234_v15 }
 0x13c   :  { %v170_v55 = vadd.f32 %v168_v54, %v163_v53  ;;  %v250_v54 = vperm.slane %v531_v6, 5 }
 0x13e   :  { %v541_v56 = vmax.f32 %v170_v55, 0.0 }
 0x140   :  { %182 = vadd.xlane.f32.xlu2 %v541_v56  ;;  %v187_v57 = vmul.f32 %v541_v56, %v541_v56  ;;  %v175_v61 = vmul.f32 %v173_v60, %v541_v56 }
 0x148   :  { %190 = vadd.xlane.f32.xlu2 %v187_v57 }
 0x1ab   :  { %v181_v9 = vpop.xlane.xlu0 %180 }
 0x1ac   :  { %v184_v10 = vmul.f32 0.015625, %v181_v9 }
 0x1ad   :  { %v189_v12 = vpop.xlane.xlu1 %188 }
 0x1ae   :  { %v194_v13 = vmul.f32 %v184_v10, %v184_v10  ;;  %v192_v14 = vmul.f32 0.015625, %v189_v12 }
 0x1b0   :  { %v196_v16 = vsub.f32 %v192_v14, %v194_v13 }
 0x1b2   :  { %v198_v17 = vadd.f32 1e-05, %v196_v16 }
 0x1b3   :  { %v183_v18 = vpop.xlane.xlu2 %182 }
 0x1b4   :  { %378 = vrsqrt.f32 %v198_v17  ;;  %v185_v19 = vmul.f32 0.015625, %v183_v18  ;;  %vm206_vm8 = vweird.f32 %v198_v17  ;;  %v314_v18 = vperm.slane %v531_v6, 6 }
 0x1b6   :  { %v195_v23 = vmul.f32 %v185_v19, %v185_v19 }
 0x1ba   :  { %v379_v20 = vpop.eup %378 }
 0x1bb   :  { %v201_v21 = vmul.f32 %v379_v20, %v198_v17  ;;  %v191_v22 = vpop.xlane.xlu2 %190  ;;  %vm207_vm7 = vweird.f32 %v379_v20 }
 0x1bc   :  { %v193_v24 = vmul.f32 0.015625, %v191_v22  ;;  %vm208_vm9 = vmor %vm206_vm8, %vm207_vm7 }
 0x1bd   :  { %v202_v25 = vmul.f32 %v379_v20, %v201_v21 }
 0x1be   :  { %v197_v26 = vsub.f32 %v193_v24, %v195_v23  ;;  %v321_v24 = vperm.slane %v531_v6, 7 }
 0x1bf   :  { %v203_v27 = vmul.f32 0.5, %v202_v25 }
 0x1c0   :  { %v199_v28 = vadd.f32 1e-05, %v197_v26 }
 0x1c1   :  { %v204_v29 = vsub.f32 1.5, %v203_v27 }
 0x1c2   :  { %380 = vrsqrt.f32 %v199_v28  ;;  %vm216_vm11 = vweird.f32 %v199_v28 }
 0x1c3   :  { %v205_v31 = vmul.f32 %v379_v20, %v204_v29  ;;  %v328_v29 = vperm.slane %v551_v59, 1 }
 0x1c5   :  { %v209_v32 = vsel %vm208_vm9, %v379_v20, %v205_v31 }
 0x1c6   :  { %v221_v33 = vmul.f32 %v220_v30, %v209_v32 }
 0x1c8   :  { %v381_v35 = vpop.eup %380  ;;  %v225_v36 = vmul.f32 %v221_v33, %v184_v10  ;;  %v223_v38 = vmul.f32 %v221_v33, %v536_v50 }
 0x1c9   :  { %v211_v37 = vmul.f32 %v381_v35, %v199_v28  ;;  %vm217_vm10 = vweird.f32 %v381_v35 }
 0x1ca   :  { %v228_v39 = vsub.f32 %v227_v34, %v225_v36  ;;  %vm218_vm12 = vmor %vm216_vm11, %vm217_vm10 }
 0x1cb   :  { %v212_v40 = vmul.f32 %v381_v35, %v211_v37 }
 0x1cc   :  { %v230_v41 = vadd.f32 %v228_v39, %v223_v38 }
 0x1cd   :  { %v213_v42 = vmul.f32 0.5, %v212_v40 }
 0x1ce   :  { %v232_v43 = vmax.f32 %v230_v41, 0.0 }
 0x1cf   :  { %v214_v44 = vsub.f32 1.5, %v213_v42 }
 0x1d0   :  { %267 = vmatmul.f32.vlgmr.msra.gmra.mxu1 %v232_v43 }
 0x1d1   :  { %v215_v45 = vmul.f32 %v381_v35, %v214_v44 }
 0x1d3   :  { %v219_v46 = vsel %vm218_vm12, %v381_v35, %v215_v45  ;;  %v337_v45 = vperm.slane %v551_v59, 2 }
 0x1d4   :  { %v222_v47 = vmul.f32 %v220_v30, %v219_v46 }
 0x1d6   :  { %v226_v48 = vmul.f32 %v222_v47, %v185_v19  ;;  %v224_v49 = vmul.f32 %v222_v47, %v541_v56 }
 0x1d8   :  { %v229_v51 = vsub.f32 %v227_v34, %v226_v48 }
 0x1da   :  { %v231_v52 = vadd.f32 %v229_v51, %v224_v49 }
 0x1dc   :  { %v233_v53 = vmax.f32 %v231_v52, 0.0 }
 0x1de   :  { %270 = vmatmul.f32.vlgmr.msra.gmra.mxu2 %v233_v53 }
 0x24d   :  { %v268_v55 = vpop.f32.mrf.mxu1 }
 0x24e   :  { %v269_v57 = vadd.f32 %v268_v55, %v250_v54 }
 0x250   :  { %274 = vadd.xlane.f32.xlu2 %v269_v57  ;;  %v280_v58 = vmul.f32 %v269_v57, %v269_v57 }
 0x252   :  { %282 = vadd.xlane.f32.xlu1 %v280_v58 }
 0x25a   :  { %178 = vadd.xlane.f32.xlu1 %v175_v61 }
 0x261   :  { %v271_v62 = vpop.f32.mrf.mxu2 }
 0x262   :  { %v272_v63 = vadd.f32 %v271_v62, %v250_v54 }
 0x264   :  { %276 = vadd.xlane.f32.xlu0 %v272_v63  ;;  %v281_v0 = vmul.f32 %v272_v63, %v272_v63 }
 0x266   :  { %284 = vadd.xlane.f32.xlu2 %v281_v0 }
 0x26c   :  { %176 = vadd.xlane.f32.xlu0 %v174_v1 }
 0x2c3   :  { %v275_v2 = vpop.xlane.xlu2 %274 }
 0x2c4   :  { %v278_v3 = vmul.f32 0.015625, %v275_v2 }
 0x2c5   :  { %v283_v4 = vpop.xlane.xlu1 %282 }
 0x2c6   :  { %v288_v5 = vmul.f32 %v278_v3, %v278_v3  ;;  %v286_v7 = vmul.f32 0.015625, %v283_v4 }
 0x2c8   :  { %v290_v8 = vsub.f32 %v286_v7, %v288_v5 }
 0x2ca   :  { %v292_v9 = vadd.f32 1e-05, %v290_v8 }
 0x2cc   :  { %382 = vrsqrt.f32 %v292_v9  ;;  %vm300_vm14 = vweird.f32 %v292_v9 }
 0x2cd   :  { %v179_v51 = vpop.xlane.xlu1 %178 }
 0x2d2   :  { %v383_v10 = vpop.eup %382 }
 0x2d3   :  { %v295_v11 = vmul.f32 %v383_v10, %v292_v9  ;;  %vm301_vm13 = vweird.f32 %v383_v10 }
 0x2d4   :  { %vm302_vm15 = vmor %vm300_vm14, %vm301_vm13 }
 0x2d5   :  { %v296_v56 = vmul.f32 %v383_v10, %v295_v11 }
 0x2d7   :  { %v297_v12 = vmul.f32 0.5, %v296_v56  ;;  %v277_v13 = vpop.xlane.xlu0 %276 }
 0x2d8   :  { %v279_v14 = vmul.f32 0.015625, %v277_v13 }
 0x2d9   :  { %v298_v15 = vsub.f32 1.5, %v297_v12  ;;  %v285_v16 = vpop.xlane.xlu2 %284 }
 0x2da   :  { %v289_v17 = vmul.f32 %v279_v14, %v279_v14  ;;  %v287_v50 = vmul.f32 0.015625, %v285_v16 }
 0x2db   :  { %v299_v19 = vmul.f32 %v383_v10, %v298_v15 }
 0x2dc   :  { %v291_v20 = vsub.f32 %v287_v50, %v289_v17 }
 0x2dd   :  { %v303_v21 = vsel %vm302_vm15, %v383_v10, %v299_v19 }
 0x2de   :  { %v293_v22 = vadd.f32 1e-05, %v291_v20  ;;  %v315_v23 = vmul.f32 %v314_v18, %v303_v21 }
 0x2df   :  { %v177_v46 = vpop.xlane.xlu0 %176 }
 0x2e0   :  { %384 = vrsqrt.f32 %v293_v22  ;;  %v319_v25 = vmul.f32 %v315_v23, %v278_v3  ;;  %v317_v26 = vmul.f32 %v315_v23, %v269_v57  ;;  %vm310_vm1 = vweird.f32 %v293_v22 }
 0x2e2   :  { %v322_v27 = vsub.f32 %v321_v24, %v319_v25 }
 0x2e4   :  { %v324_v28 = vadd.f32 %v322_v27, %v317_v26 }
 0x2e6   :  { %v385_v30 = vpop.eup %384  ;;  %v326_v31 = vmax.f32 %v324_v28, 0.0 }
 0x2e7   :  { %v305_v32 = vmul.f32 %v385_v30, %v293_v22  ;;  %vm311_vm0 = vweird.f32 %v385_v30 }
 0x2e8   :  { %v329_v33 = vmul.f32 %v328_v29, %v326_v31  ;;  %vm312_vm2 = vmor %vm310_vm1, %vm311_vm0 }
 0x2e9   :  { %v306_v34 = vmul.f32 %v385_v30, %v305_v32 }
 0x2ea   :  { %331 = vadd.xlane.f32.xlu2 %v329_v33 }
 0x2eb   :  { %v307_v35 = vmul.f32 0.5, %v306_v34 }
 0x2ed   :  { %v308_v36 = vsub.f32 1.5, %v307_v35 }
 0x2ef   :  { %v309_v37 = vmul.f32 %v385_v30, %v308_v36 }
 0x2f1   :  { %v313_v6 = vsel %vm312_vm2, %v385_v30, %v309_v37 }
 0x2f2   :  { %v316_v38 = vmul.f32 %v314_v18, %v313_v6 }
 0x2f4   :  { %v320_v39 = vmul.f32 %v316_v38, %v279_v14  ;;  %v318_v40 = vmul.f32 %v316_v38, %v272_v63 }
 0x2f6   :  { %v323_v41 = vsub.f32 %v321_v24, %v320_v39 }
 0x2f8   :  { %v325_v42 = vadd.f32 %v323_v41, %v318_v40 }
 0x2fa   :  { %v327_v43 = vmax.f32 %v325_v42, 0.0 }
 0x2fc   :  { %v330_v44 = vmul.f32 %v328_v29, %v327_v43 }
 0x2fe   :  { %333 = vadd.xlane.f32.xlu0 %v330_v44 }
 0x35d   :  { %v332_v47 = vpop.xlane.xlu2 %331 }
 0x35e   :  { %v335_v48 = vadd.f32 %v332_v47, %v177_v46 }
 0x360   :  { %v338_v49 = vadd.f32 %v337_v45, %v335_v48 }
 0x362   :  { %341 = vst.msk [vmem:[%s570_s4] sm:$0xff] %vm340_vm3, %v338_v49 }
 0x371   :  { %v334_v52 = vpop.xlane.xlu0 %333 }
 0x372   :  { %v336_v53 = vadd.f32 %v334_v52, %v179_v51 }
 0x374   :  { %v339_v54 = vadd.f32 %v337_v45, %v336_v53 }
 0x376   :  { %342 = vst.msk [vmem:[%s570_s4 + $0x8] sm:$0xff] %vm340_vm3, %v339_v54 }
 0x377   :  { %347 = vsyncpa [#allocation3], 1 }
 0x378   :  { %348 = vsyncpa [#allocation5], 1 }
 0x379   :  { %349 = vsyncpa [#allocation8], 1 }

</bundles_post_ra>
